<compile_context>
chip_gen: v5e
topology: v5e:2x2
jax: 0.10.0
libtpu: 0.0.40
codegen_flags: <defaults>
</compile_context>

<pallas_src>
import jax
import jax.numpy as jnp
from jax.experimental import pallas as pl
from jax.experimental.pallas import tpu as pltpu


def _round_up(x, m):
    return ((x + m - 1) // m) * m


def _conv1x1_kernel(x_ref, w_ref, b_ref, o_ref):
    """x_ref: (1, Cin, tl), w_ref: (Cout, Cin), b_ref: (Cout, 1), o_ref: (1, Cout, tl)."""
    y = jnp.dot(w_ref[...], x_ref[0], preferred_element_type=jnp.float32)
    o_ref[0] = (y + b_ref[...]).astype(o_ref.dtype)


def out_conv(x, weight, bias):
    """OutConv.forward: 1x1 Conv2d in native NCHW layout.

    x:      (N, Cin, H, W) float32
    weight: (Cout, Cin, 1, 1) float32   (PyTorch Conv2d weight layout)
    bias:   (Cout,) float32
    returns (N, Cout, H, W) float32
    """
    N, Cin, H, W = x.shape
    w2 = weight.reshape(weight.shape[0], Cin).astype(jnp.float32)  # (Cout, Cin)
    Cout = w2.shape[0]
    b2 = bias.reshape(Cout, 1).astype(jnp.float32)

    L = H * W
    x3 = x.reshape(N, Cin, L)  # contiguous merge, no data movement

    # Lane tile over pixels: multiple of 128, sized so the (Cin, tl) x-block
    # stays within a ~4 MiB per-buffer budget (double-buffered by Pallas).
    x_block_budget = 4 * 1024 * 1024
    tl_budget = max(128, (x_block_budget // (Cin * 4)) // 128 * 128)
    tl = min(_round_up(L, 128), tl_budget)
    Lp = _round_up(L, tl)
    if Lp != L:
        x3 = jnp.pad(x3, ((0, 0), (0, 0), (0, Lp - L)))

    out = pl.pallas_call(
        _conv1x1_kernel,
        out_shape=jax.ShapeDtypeStruct((N, Cout, Lp), jnp.float32),
        grid_spec=pltpu.PrefetchScalarGridSpec(
            num_scalar_prefetch=0,
            grid=(N, Lp // tl),
            in_specs=[
                pl.BlockSpec((1, Cin, tl), lambda n, l: (n, 0, l)),
                pl.BlockSpec((Cout, Cin), lambda n, l: (0, 0)),
                pl.BlockSpec((Cout, 1), lambda n, l: (0, 0)),
            ],
            out_specs=pl.BlockSpec((1, Cout, tl), lambda n, l: (n, 0, l)),
        ),
        compiler_params=pltpu.CompilerParams(
            dimension_semantics=("parallel", "parallel")),
    )(x3, w2, b2)

    if Lp != L:
        out = out[:, :, :L]
    return out.reshape(N, Cout, H, W)


if __name__ == "__main__":
    key = jax.random.PRNGKey(0)
    kx, kw, kb = jax.random.split(key, 3)

    # Small shapes consistent with OutConv's role (UNet head: 64 -> n_classes).
    N, Cin, Cout, Hs, Ws = 2, 64, 3, 16, 16
    x = jax.random.normal(kx, (N, Cin, Hs, Ws), jnp.float32)
    w = 0.1 * jax.random.normal(kw, (Cout, Cin, 1, 1), jnp.float32)
    b = 0.1 * jax.random.normal(kb, (Cout,), jnp.float32)

    fwd = jax.jit(out_conv)
    y = fwd(x, w, b)
    jax.block_until_ready(y)

    assert y.shape == (N, Cout, Hs, Ws), y.shape
    # Pure-JAX reference for the 1x1 conv numerics.
    y_ref = jnp.einsum("nchw,oc->nohw", x, w.reshape(Cout, Cin)) \
        + b[None, :, None, None]
    assert jnp.allclose(y, y_ref, atol=1e-4, rtol=1e-4), float(
        jnp.max(jnp.abs(y - y_ref)))
    assert bool(jnp.all(jnp.isfinite(y)))
    print("KERNEL_OK")
</pallas_src>

<mosaic_0001>
module attributes {stable_mosaic.version = 11 : i64} {
  func.func @_conv1x1_kernel(%arg0: i32, %arg1: i32, %arg2: memref<1x64x256xf32, #tpu.memory_space<vmem>>, %arg3: memref<3x64xf32, #tpu.memory_space<vmem>>, %arg4: memref<3x1xf32, #tpu.memory_space<vmem>>, %arg5: memref<1x3x256xf32, #tpu.memory_space<vmem>>) attributes {dimension_semantics = [#tpu.dimension_semantics<parallel>, #tpu.dimension_semantics<parallel>], iteration_bounds = array<i64: 2, 1>, scalar_prefetch = 0 : i64, scratch_operands = 0 : i64, tpu.core_type = #tpu.core_type<tc>, window_params = [{transform_indices = @transform_0, window_bounds = array<i64: 1, 64, 256>}, {pipeline_mode = #tpu.pipeline_mode<synchronous>, transform_indices = @transform_1, window_bounds = array<i64: 3, 64>}, {pipeline_mode = #tpu.pipeline_mode<synchronous>, transform_indices = @transform_2, window_bounds = array<i64: 3, 1>}, {transform_indices = @transform_3, window_bounds = array<i64: 1, 3, 256>}]} {
    %c0 = arith.constant 0 : index
    %c0_0 = arith.constant 0 : index
    %0 = vector.load %arg3[%c0, %c0_0] : memref<3x64xf32, #tpu.memory_space<vmem>>, vector<3x64xf32>
    %c0_1 = arith.constant 0 : index
    %c0_2 = arith.constant 0 : index
    %c0_3 = arith.constant 0 : index
    %1 = vector.load %arg2[%c0_1, %c0_2, %c0_3] : memref<1x64x256xf32, #tpu.memory_space<vmem>>, vector<1x64x256xf32>
    %2 = vector.shape_cast %1 : vector<1x64x256xf32> to vector<64x256xf32>
    %cst = arith.constant dense<0.000000e+00> : vector<3x256xf32>
    %3 = tpu.matmul %0, %2, %cst {dimension_numbers = #tpu.dot_dimension_numbers<[1], [0], [0], [1], [0, 0, 1, 1], [], []>} : vector<3x64xf32>, vector<64x256xf32>, vector<3x256xf32> -> vector<3x256xf32>
    %c0_4 = arith.constant 0 : index
    %c0_5 = arith.constant 0 : index
    %4 = vector.load %arg4[%c0_4, %c0_5] : memref<3x1xf32, #tpu.memory_space<vmem>>, vector<3x1xf32>
    %5 = vector.broadcast %4 : vector<3x1xf32> to vector<3x256xf32>
    %6 = arith.addf %3, %5 : vector<3x256xf32>
    %c0_6 = arith.constant 0 : index
    %c0_7 = arith.constant 0 : index
    %c0_8 = arith.constant 0 : index
    %7 = vector.load %arg5[%c0_6, %c0_7, %c0_8] : memref<1x3x256xf32, #tpu.memory_space<vmem>>, vector<1x3x256xf32>
    %8 = vector.shape_cast %7 : vector<1x3x256xf32> to vector<3x256xf32>
    %9 = vector.shape_cast %6 : vector<3x256xf32> to vector<1x3x256xf32>
    tpu.vector_store %arg5[%c0_6, %c0_7, %c0_8], %9 {strides = array<i32>} : memref<1x3x256xf32, #tpu.memory_space<vmem>>, vector<1x3x256xf32>,
    return
  }
  func.func @transform_0(%arg0: i32, %arg1: i32) -> (i32, i32, i32) {
    %c0_i32 = arith.constant 0 : i32
    %c0_i32_0 = arith.constant 0 : i32
    return %arg0, %c0_i32, %arg1 : i32, i32, i32
  }
  func.func @transform_1(%arg0: i32, %arg1: i32) -> (i32, i32) {
    %c0_i32 = arith.constant 0 : i32
    %c0_i32_0 = arith.constant 0 : i32
    %c0_i32_1 = arith.constant 0 : i32
    return %c0_i32, %c0_i32_0 : i32, i32
  }
  func.func @transform_2(%arg0: i32, %arg1: i32) -> (i32, i32) {
    %c0_i32 = arith.constant 0 : i32
    %c0_i32_0 = arith.constant 0 : i32
    %c0_i32_1 = arith.constant 0 : i32
    return %c0_i32, %c0_i32_0 : i32, i32
  }
  func.func @transform_3(%arg0: i32, %arg1: i32) -> (i32, i32, i32) {
    %c0_i32 = arith.constant 0 : i32
    %c0_i32_0 = arith.constant 0 : i32
    return %arg0, %c0_i32, %arg1 : i32, i32, i32
  }
}

</mosaic_0001>

<bundles_post_ra>
// kernel: out_conv.1
= control target key start
LH: loop header
LB: loop body
LE: loop exit
PB: predicated region body
PF: predicated region fallthrough
CT: control target
= control target key end

     0   :  { %s457_s12 = smov 0   ;;  %s459_s13 = smov 0   ;;  %s500_s0 = inlined_call_operand.vmem [shape: f32[2,64,256], index: 0, kind: input, shape index: {}]   ;;  %s501_s1 = inlined_call_operand.vmem [shape: f32[3,64], index: 1, kind: input, shape index: {}]   ;;  %s502_s2 = inlined_call_operand.vmem [shape: f32[3,1], index: 2, kind: input, shape index: {}]   ;;  %s503_s3 = inlined_call_operand.vmem [shape: f32[2,3,256], index: 3, kind: output, shape index: {}]  }
   0x1   :  { %s461_s14 = smov 0  }
   0x2 LB: > { %s25_s15 = sadd.s32 1, %s430_s13  ;;  %p375_p0 = scmp.ge.s32.totalorder %s434_s14, 1  ;;  %s434_s14 = sphi %s461_s14, %s13_s14   ;;  %s430_s13 = sphi %s459_s13, %s505_s13   ;;  %s426_s12 = sphi %s457_s12, %s504_s12  }
   0x3   : > { %p27_p1 = scmp.ge.s32.totalorder %s25_s15, 2  ;;  %p158_p2 = scmp.lt.s32.totalorder %s434_s14, 3 }
   0x5   : > { %s507_s15 = smov (%p27_p1, %s25_s15), 0  ;;  %p159_p3 = pnand %p375_p0, %p158_p2 }
   0x6   : > { %p191_p4 = scmp.lt.s32.totalorder (!%p159_p3), %s426_s12, 1 }
   0x7   : > { %162 = sbr.rel (%p159_p3) target bundleno = 163 (0xa3), region = 32 }
   0xc   : > { %v436_v0 = vmov 0   ;;  %v227_v1 = vld [vmem:[%s502_s2] sm:$0x7]  ;;  %s509_s12 = smov (!%p191_p4, %s426_s12), 1  ;;  %vm233_vm0 = vcmask 523264   ;;  %vm280_vm1 = vcmask 1043456  }
   0xd   : > { %411 = vset.pattern.permute.xlu0 %v436_v0  ;;  %s384_s18 = sshll.u32 %s509_s12, 7  ;;  %v210_v18 = vld [vmem:[%s501_s1] sm:$0x7]  ;;  %s385_s24 = sshll.u32 %s509_s12, 3 }
   0xe   : > { %230 = vperm.xlu0 %411, %v227_v1   ;;  %s198_s21 = scalar_lea.vmem %s500_s0, %s384_s18  ;;  %s208_s27 = scalar_lea.vmem %s503_s3, %s385_s24 }
   0xf   : > { %v225_v2 = vld [vmem:[%s198_s21 + $0x70] sm:$0xff]  ;;  %v226_v3 = vld [vmem:[%s198_s21 + $0x78] sm:$0xff]  ;;  %v223_v4 = vld [vmem:[%s198_s21 + $0x60] sm:$0xff] }
  0x10   : > { %245 = vmatpush.msra.mxu0 %v225_v2  ;;  %265 = vmatpush.msra.mxu1 %v226_v3  ;;  %v224_v5 = vld [vmem:[%s198_s21 + $0x68] sm:$0xff]  ;;  %v221_v6 = vld [vmem:[%s198_s21 + $0x50] sm:$0xff]  ;;  %v222_v7 = vld [vmem:[%s198_s21 + $0x58] sm:$0xff] }
  0x11   : > { %v219_v8 = vld [vmem:[%s198_s21 + $0x40] sm:$0xff]  ;;  %v220_v9 = vld [vmem:[%s198_s21 + $0x48] sm:$0xff]  ;;  %v217_v10 = vld [vmem:[%s198_s21 + $0x30] sm:$0xff] }
  0x12   : > { %246 = vmatpush.msra.mxu0 %v223_v4  ;;  %266 = vmatpush.msra.mxu1 %v224_v5  ;;  %v218_v11 = vld [vmem:[%s198_s21 + $0x38] sm:$0xff]  ;;  %v215_v12 = vld [vmem:[%s198_s21 + $0x20] sm:$0xff]  ;;  %v216_v13 = vld [vmem:[%s198_s21 + $0x28] sm:$0xff] }
  0x13   : > { %v213_v14 = vld [vmem:[%s198_s21 + $0x10] sm:$0xff]  ;;  %v214_v15 = vld [vmem:[%s198_s21 + $0x18] sm:$0xff]  ;;  %v211_v16 = vld [vmem:[%s198_s21] sm:$0xff] }
  0x14   : > { %247 = vmatpush.msra.mxu0 %v221_v6  ;;  %267 = vmatpush.msra.mxu1 %v222_v7  ;;  %v212_v17 = vld [vmem:[%s198_s21 + $0x8] sm:$0xff] }
  0x16   : > { %248 = vmatpush.msra.mxu0 %v219_v8  ;;  %268 = vmatpush.msra.mxu1 %v220_v9 }
  0x18   : > { %249 = vmatpush.msra.mxu0 %v217_v10  ;;  %269 = vmatpush.msra.mxu1 %v218_v11 }
  0x1a   : > { %250 = vmatpush.msra.mxu0 %v215_v12  ;;  %270 = vmatpush.msra.mxu1 %v216_v13 }
  0x1c   : > { %251 = vmatpush.msra.mxu0 %v213_v14  ;;  %271 = vmatpush.msra.mxu1 %v214_v15 }
  0x1e   : > { %252 = vmatpush.msra.mxu0 %v211_v16  ;;  %272 = vmatpush.msra.mxu1 %v212_v17 }
  0x1f   : > { %380 = vmatmul.msk.f32.vlgmr.msra.gmra.mxu0 %vm233_vm0, %v210_v18  ;;  %381 = vmatmul.msk.f32.vlgmr.msra.gmra.mxu1 %vm233_vm0, %v210_v18 }
  0x80   : > { %v231_v19 = vpop.permute.xlu0 %230 }
  0x9c   : > { %v254_v20 = vpop.f32.mrf.mxu0  ;;  %v274_v21 = vpop.f32.mrf.mxu1 }
  0x9d   : > { %v275_v22 = vadd.f32 %v274_v21, %v231_v19  ;;  %v255_v23 = vadd.f32 %v254_v20, %v231_v19 }
  0x9f   : > { %v279_v24 = vrot.slane %v275_v22, 4 }
  0xa1   : > { %v281_v25 = vsel %vm280_vm1, %v255_v23, %v279_v24 }
  0xa2   : > { %283 = vst [vmem:[%s208_s27] sm:$0x77] %v281_v25 }
  0xa3 PF: > { %s13_s14 = sadd.s32 1, %s434_s14   ;;  %s504_s12 = smov %s430_s13 }
  0xa4   : > { %p10_p5 = scmp.ge.s32.totalorder %s13_s14, 4   ;;  %s505_s13 = smov %s507_s15 }
  0xa6   :  { %12 = sbr.rel (!%p10_p5) target bundleno = 2 (0x2), region = 62 }

</bundles_post_ra>
